<compile_context>
chip_gen: v6e
topology: v6e:2x2x1
jax: 0.10.0
libtpu: 0.0.40
codegen_flags: <defaults>
</compile_context>

<pallas_src>
import jax
import jax.numpy as jnp
from jax import lax
from jax.experimental import pallas as pl
from jax.experimental.pallas import tpu as pltpu


def _head_kernel(x_ref, w_ref, attn_ref, out_ref):
    # x_ref:    (M, E)   with M = B*T (flattened batch*time slab)
    # w_ref:    (E, 3H)  fused [Wk | Wq | Wv * head_size**-0.5]
    # attn_ref: (M, T)   flat per-row attention (caller reshapes to (B, T, T))
    # out_ref:  (M, H)   flat results            (caller reshapes to (B, T, H))
    M, T = attn_ref.shape
    H = out_ref.shape[-1]
    B = M // T

    # Single fused QKV projection on the MXU: (M, E) x (E, 3H).
    kqv = jnp.dot(x_ref[...], w_ref[...], preferred_element_type=jnp.float32)
    k = kqv[:, 0:H]
    q = kqv[:, H:2 * H]
    v = kqv[:, 2 * H:3 * H]          # head_size**-0.5 already folded into the weight

    # Block-diagonal attention: one (M, M) score matmul covers every batch,
    # contracting the last dims of q and k so no transpose is materialized.
    scores = lax.dot_general(
        q, k,
        dimension_numbers=(((1,), (1,)), ((), ())),
        preferred_element_type=jnp.float32)                       # (M, M)

    row = lax.broadcasted_iota(jnp.int32, (M, M), 0)
    col = lax.broadcasted_iota(jnp.int32, (M, M), 1)
    if T & (T - 1) == 0:
        # Power-of-two T: block id via bitwise AND (cheap VPU ops, no int div).
        same_block = (row & ~(T - 1)) == (col & ~(T - 1))
    else:
        # Generic T: f32 floor-scale avoids vector integer division.
        inv_t = jnp.float32(1.0 / T)
        same_block = (jnp.floor(row.astype(jnp.float32) * inv_t)
                      == jnp.floor(col.astype(jnp.float32) * inv_t))
    mask = same_block & (row >= col)
    # The causal diagonal is never masked, so no row is all -inf and the
    # softmax below cannot see exp(-inf - (-inf)).
    # TODO(synk): guard with a finite mask value if look_forward / padding ever
    #             allows fully-masked rows.
    wei = jnp.where(mask, scores, -jnp.inf)

    # Numerically stable row-wise softmax with an exact divide (the EUP is not
    # a bottleneck at these shapes; the approximate reciprocal only lost bits).
    m = jnp.max(wei, axis=-1, keepdims=True)
    e = jnp.exp(wei - m)
    attention = e / jnp.sum(e, axis=-1, keepdims=True)            # (M, M)

    # Cross-block entries of `attention` are exactly zero (exp(-inf) == 0), so a
    # single (M, M) x (M, H) matmul yields every batch's attention @ v at once.
    out_ref[...] = jnp.dot(attention, v, preferred_element_type=jnp.float32)

    # Extract the (T, T) diagonal blocks into the flat (M, T) layout by summing
    # the B lane groups — exact (only one non-zero term per position), done once
    # per call, and avoids any per-batch MXU or store work.
    attn_bt = attention[:, 0:T]
    for b in range(1, B):
        attn_bt = attn_bt + attention[:, b * T:(b + 1) * T]
    attn_ref[...] = attn_bt


def prepare_head_weights(wk, wq, wv, head_size):
    """Build the fused [Wk | Wq | Wv * head_size**-0.5] projection ONCE at
    weight-prep time, keeping the concat and the value scaling off the
    per-call path."""
    return jnp.concatenate([wk, wq, wv * (head_size ** -0.5)], axis=1)  # (E, 3H)


@jax.jit
def head_forward(x, w_kqv):
    """x: (B, T, E) f32; w_kqv: (E, 3H) f32 from prepare_head_weights.

    Returns (attention_M, results) matching Head.forward in eval mode
    (dropout is identity, so attention == attention_M).
    """
    B, T, E = x.shape
    H = w_kqv.shape[1] // 3
    M = B * T
    x2d = x.reshape(M, E)                       # contiguous -> free reshape
    vmem = pltpu.MemorySpace.VMEM

    attn_flat, out_flat = pl.pallas_call(
        _head_kernel,
        out_shape=(
            jax.ShapeDtypeStruct((M, T), jnp.float32),   # attention, flat
            jax.ShapeDtypeStruct((M, H), jnp.float32),   # results,   flat
        ),
        in_specs=[
            pl.BlockSpec(memory_space=vmem),   # x2d   (M, E)
            pl.BlockSpec(memory_space=vmem),   # w_kqv (E, 3H)
        ],
        out_specs=(
            pl.BlockSpec(memory_space=vmem),
            pl.BlockSpec(memory_space=vmem),
        ),
    )(x2d, w_kqv)

    # Row-major (M, .) is bit-identical to (B, T, .): wrapper reshape is free.
    return attn_flat.reshape(B, T, T), out_flat.reshape(B, T, H)


def _reference(x, wk, wq, wv, head_size):
    hp = jax.lax.Precision.HIGHEST
    k = jnp.matmul(x, wk, precision=hp)
    q = jnp.matmul(x, wq, precision=hp)
    v = jnp.matmul(x, wv, precision=hp) * (head_size ** -0.5)
    wei = jnp.matmul(q, jnp.swapaxes(k, -1, -2), precision=hp)
    T = x.shape[1]
    tril = jnp.tril(jnp.ones((T, T)))
    wei = jnp.where(tril == 0, -jnp.inf, wei)
    attn = jax.nn.softmax(wei, axis=-1)
    return attn, jnp.matmul(attn, v, precision=hp)


if __name__ == "__main__":
    # Small shapes consistent with the module: B=2, T=block_size=8,
    # n_embd=32, head_size=16.
    B, T, n_embd, head_size = 2, 8, 32, 16

    key = jax.random.PRNGKey(0)
    kx, kk_, kq_, kv_ = jax.random.split(key, 4)

    x = jax.random.normal(kx, (B, T, n_embd), dtype=jnp.float32)
    # nn.Linear(n_embd, head_size, bias=False) weight is (head_size, n_embd);
    # we store the transposed (n_embd, head_size) version for x @ W.
    s = 1.0 / (n_embd ** 0.5)
    wk = jax.random.uniform(kk_, (n_embd, head_size), jnp.float32, -s, s)
    wq = jax.random.uniform(kq_, (n_embd, head_size), jnp.float32, -s, s)
    wv = jax.random.uniform(kv_, (n_embd, head_size), jnp.float32, -s, s)

    # Weight fusion + value scaling happen once here, not on every forward.
    w_kqv = prepare_head_weights(wk, wq, wv, head_size)

    attn, out = head_forward(x, w_kqv)
    jax.block_until_ready((attn, out))

    ref_attn, ref_out = _reference(x, wk, wq, wv, head_size)
    # The softmax divide is now exact (approx reciprocal removed).  The
    # remaining tolerance is conservative headroom for f32->bf16-pass matmul
    # decomposition differences between the MXU kernel and the HIGHEST-precision
    # XLA reference; observed error is expected to be far below this bound.
    assert jnp.allclose(attn, ref_attn, atol=2e-3, rtol=2e-3)
    assert jnp.allclose(out, ref_out, atol=2e-3, rtol=2e-3)

    print("KERNEL_OK")
</pallas_src>

<mosaic_0001>
module attributes {stable_mosaic.version = 11 : i64} {
  func.func @_head_kernel(%arg0: memref<16x32xf32, #tpu.memory_space<vmem>>, %arg1: memref<32x48xf32, #tpu.memory_space<vmem>>, %arg2: memref<16x8xf32, #tpu.memory_space<vmem>>, %arg3: memref<16x16xf32, #tpu.memory_space<vmem>>) attributes {dimension_semantics = [], scalar_prefetch = 0 : i64, scratch_operands = 0 : i64, tpu.core_type = #tpu.core_type<tc>} {
    %c0 = arith.constant 0 : index
    %c0_0 = arith.constant 0 : index
    %0 = vector.load %arg0[%c0, %c0_0] : memref<16x32xf32, #tpu.memory_space<vmem>>, vector<16x32xf32>
    %c0_1 = arith.constant 0 : index
    %c0_2 = arith.constant 0 : index
    %1 = vector.load %arg1[%c0_1, %c0_2] : memref<32x48xf32, #tpu.memory_space<vmem>>, vector<32x48xf32>
    %cst = arith.constant dense<0.000000e+00> : vector<16x48xf32>
    %2 = tpu.matmul %0, %1, %cst {dimension_numbers = #tpu.dot_dimension_numbers<[1], [0], [0], [1], [0, 0, 1, 1], [], []>} : vector<16x32xf32>, vector<32x48xf32>, vector<16x48xf32> -> vector<16x48xf32>
    %3 = vector.extract_strided_slice %2 {offsets = [0, 0], sizes = [16, 16], strides = [1, 1]} : vector<16x48xf32> to vector<16x16xf32>
    %4 = vector.extract_strided_slice %2 {offsets = [0, 16], sizes = [16, 16], strides = [1, 1]} : vector<16x48xf32> to vector<16x16xf32>
    %5 = vector.extract_strided_slice %2 {offsets = [0, 32], sizes = [16, 16], strides = [1, 1]} : vector<16x48xf32> to vector<16x16xf32>
    %cst_3 = arith.constant dense<0.000000e+00> : vector<16x16xf32>
    %6 = tpu.matmul %4, %3, %cst_3 {dimension_numbers = #tpu.dot_dimension_numbers<[1], [1], [0], [0], [0, 0, 1, 0], [], []>} : vector<16x16xf32>, vector<16x16xf32>, vector<16x16xf32> -> vector<16x16xf32>
    %7 = tpu.iota {dimensions = array<i32: 0>} : vector<16x16xi32>
    %8 = tpu.iota {dimensions = array<i32: 1>} : vector<16x16xi32>
    %c-8_i32 = arith.constant -8 : i32
    %9 = vector.broadcast %c-8_i32 : i32 to vector<16x16xi32>
    %10 = arith.andi %7, %9 : vector<16x16xi32>
    %c-8_i32_4 = arith.constant -8 : i32
    %11 = vector.broadcast %c-8_i32_4 : i32 to vector<16x16xi32>
    %12 = arith.andi %8, %11 : vector<16x16xi32>
    %13 = arith.cmpi eq, %10, %12 : vector<16x16xi32>
    %14 = arith.cmpi sge, %7, %8 : vector<16x16xi32>
    %15 = arith.andi %13, %14 : vector<16x16xi1>
    %cst_5 = arith.constant 0xFF800000 : f32
    %16 = vector.broadcast %cst_5 : f32 to vector<16x16xf32>
    %17 = arith.select %15, %6, %16 : vector<16x16xi1>, vector<16x16xf32>
    %cst_6 = arith.constant dense<0xFF800000> : vector<16xf32>
    %18 = vector.multi_reduction <maximumf>, %17, %cst_6 [1] : vector<16x16xf32> to vector<16xf32>
    %19 = vector.shape_cast %18 : vector<16xf32> to vector<16x1xf32>
    %20 = vector.broadcast %19 : vector<16x1xf32> to vector<16x16xf32>
    %21 = arith.subf %17, %20 : vector<16x16xf32>
    %22 = math.exp %21 : vector<16x16xf32>
    %cst_7 = arith.constant dense<0.000000e+00> : vector<16xf32>
    %23 = vector.multi_reduction <add>, %22, %cst_7 [1] : vector<16x16xf32> to vector<16xf32>
    %24 = vector.shape_cast %23 : vector<16xf32> to vector<16x1xf32>
    %25 = vector.broadcast %24 : vector<16x1xf32> to vector<16x16xf32>
    %26 = arith.divf %22, %25 : vector<16x16xf32>
    %cst_8 = arith.constant dense<0.000000e+00> : vector<16x16xf32>
    %27 = tpu.matmul %26, %5, %cst_8 {dimension_numbers = #tpu.dot_dimension_numbers<[1], [0], [0], [1], [0, 0, 1, 1], [], []>} : vector<16x16xf32>, vector<16x16xf32>, vector<16x16xf32> -> vector<16x16xf32>
    %c0_9 = arith.constant 0 : index
    %c0_10 = arith.constant 0 : index
    %28 = vector.load %arg3[%c0_9, %c0_10] : memref<16x16xf32, #tpu.memory_space<vmem>>, vector<16x16xf32>
    tpu.vector_store %arg3[%c0_9, %c0_10], %27 {strides = array<i32>} : memref<16x16xf32, #tpu.memory_space<vmem>>, vector<16x16xf32>,
    %29 = vector.extract_strided_slice %26 {offsets = [0, 0], sizes = [16, 8], strides = [1, 1]} : vector<16x16xf32> to vector<16x8xf32>
    %30 = vector.extract_strided_slice %26 {offsets = [0, 8], sizes = [16, 8], strides = [1, 1]} : vector<16x16xf32> to vector<16x8xf32>
    %31 = arith.addf %29, %30 : vector<16x8xf32>
    %c0_11 = arith.constant 0 : index
    %c0_12 = arith.constant 0 : index
    %32 = vector.load %arg2[%c0_11, %c0_12] : memref<16x8xf32, #tpu.memory_space<vmem>>, vector<16x8xf32>
    tpu.vector_store %arg2[%c0_11, %c0_12], %31 {strides = array<i32>} : memref<16x8xf32, #tpu.memory_space<vmem>>, vector<16x8xf32>,
    return
  }
}

</mosaic_0001>

<bundles_post_ra>
// kernel: head_forward.1
= control target key start
LH: loop header
LB: loop body
LE: loop exit
PB: predicated region body
PF: predicated region fallthrough
CT: control target
= control target key end

     0   :  { %9 = vsyncpa [#allocation3], 0  ;;  %s614_s0 = inlined_call_operand.hbm [shape: f32[16,32], index: 0, kind: input, shape index: {}]   ;;  %s615_s1 = inlined_call_operand.hbm [shape: f32[32,48], index: 1, kind: input, shape index: {}]   ;;  %s616_s2 = inlined_call_operand.hbm [shape: f32[16,8], index: 2, kind: output, shape index: {0}]   ;;  %s617_s3 = inlined_call_operand.hbm [shape: f32[16,16], index: 3, kind: output, shape index: {1}]  }
   0x1   :  { %10 = vsyncpa [#allocation6], 0 }
   0x2   :  { %11 = vsyncpa [#allocation4], 0 }
   0x3   :  { %12 = vsyncpa [#allocation9], 0  ;;  %s545_s12 = smov [#allocation2]  }
   0x4   :  { %s18_s13 = sshll.u32 %s545_s12, 4  ;;  %s19_s13 = int_to_ptr.vmem [resolvable:$true] %s18_s13 }
   0x5   :  { %s465_s14 = scalar_lea.vmem %s19_s13, 256  ;;  %p470_p1 = scmp.lt.s32.totalorder %s19_s13, %s19_s13 }
   0x6   :  { %p466_p0 = scmp.ne.s32.totalorder %s19_s13, %s465_s14  ;;  %p471_p2 = scmp.lt.s32.totalorder %s465_s14, %s465_s14 }
   0x8   :  { %p472_p3 = por %p471_p2, %p470_p1 }
   0xa   :  { %p473_p4 = pnand %p472_p3, %p466_p0 }
   0xc   :  { %476 = shalt.err (!%p473_p4)
}
   0xd   :  { %s546_s15 = smov 128   ;;  %s547_s16 = smov 8  }
   0xe   :  { %24 = dma.hbm_to_vmem [thread:$0]  %s614_s0, 256, %s19_s13, [#allocation3], %s546_s15, %s546_s15, %s547_s16  }
   0xf   :  { %s548_s19 = smov [#allocation5]  }
  0x10   :  { %s30_s20 = sshll.u32 %s548_s19, 4  ;;  %s31_s20 = int_to_ptr.vmem [resolvable:$true] %s30_s20 }
  0x11   :  { %s485_s21 = scalar_lea.vmem %s31_s20, 512  ;;  %p490_p6 = scmp.lt.s32.totalorder %s31_s20, %s31_s20 }
  0x12   :  { %p486_p5 = scmp.ne.s32.totalorder %s31_s20, %s485_s21  ;;  %p491_p7 = scmp.lt.s32.totalorder %s485_s21, %s485_s21 }
  0x14   :  { %p492_p8 = por %p491_p7, %p490_p6 }
  0x16   :  { %p493_p9 = pnand %p492_p8, %p486_p5 }
  0x18   :  { %496 = shalt.err (!%p493_p9)
}
  0x19   :  { %36 = dma.hbm_to_vmem [thread:$0]  %s615_s1, 512, %s31_s20, [#allocation6], %s546_s15, %s546_s15, %s547_s16  }
  0x1a   :  { %537 = dma.done.wait [#allocation3], 256  }
  0x1b   :  { %538 = vsyncadd [#allocation3], 4294967040 }
  0x1c   :  { %539 = dma.done.wait [#allocation6], 512  }
  0x1d   :  { %540 = vsyncadd [#allocation6], 4294966784  ;;  %vm49_vm0 = vcmask 261120   ;;  %v48_v0 = vld [vmem:[#allocation5 + $0x18] sm:$0xff]  ;;  %v47_v1 = vld [vmem:[#allocation5 + $0x10] sm:$0xff]  ;;  %vm137_vm1 = vcmask 130048   ;;  %v221_v10 = vlaneseq }
  0x1e   :  { %415 = vmatprep.subr.mxu0 %v48_v0  ;;  %v43_v2 = vld [vmem:[#allocation2] sm:$0xff]  ;;  %v46_v3 = vld [vmem:[#allocation5 + $0x8] sm:$0xff]  ;;  %v45_v4 = vld [vmem:[#allocation5] sm:$0xff]  ;;  %s549_s0 = smov 112   ;;  %s550_s1 = smov 96   ;;  %vm356_vm8 = vcmask 64512  }
  0x1f   :  { %416 = vmatpush3.msra.mxu0 %v48_v0  ;;  %423 = vmatprep.mubr.msk.f32.mxu0 %vm49_vm0, %v43_v2  ;;  %v44_v5 = vld [vmem:[#allocation2 + $0x8] sm:$0xff]  ;;  %v222_v11 = vshrl.u32 %v221_v10, 7  ;;  %v225_v13 = vand.u32 127, %v221_v10  ;;  %s551_s24 = smov 120   ;;  %s552_s25 = smov [#allocation7]  }
  0x20   :  { %417 = vmatprep.subr.mxu0 %v47_v1  ;;  %s364_s26 = sshll.u32 %s552_s25, 4  ;;  %s365_s26 = int_to_ptr.vmem [resolvable:$true] %s364_s26 }
  0x21   :  { %418 = vmatpush3.msra.mxu0 %v47_v1  ;;  %v223_v12 = vadd.s32 8, %v222_v11  ;;  %v226_v14 = vand.u32 4294967288, %v222_v11  ;;  %v228_v16 = vand.u32 4294967288, %v225_v13  ;;  %vm231_vm3 = vcmp.ge.s32.totalorder %v222_v11, %v225_v13  ;;  %s497_s27 = scalar_lea.vmem %s365_s26, 256  ;;  %p502_p11 = scmp.lt.s32.totalorder %s365_s26, %s365_s26 }
  0x22   :  { %419 = vmatprep.subr.mxu0 %v46_v3  ;;  %p498_p10 = scmp.ne.s32.totalorder %s365_s26, %s497_s27  ;;  %p503_p12 = scmp.lt.s32.totalorder %s497_s27, %s497_s27 }
  0x23   :  { %420 = vmatpush3.msra.mxu0 %v46_v3  ;;  %v227_v15 = vand.u32 4294967288, %v223_v12  ;;  %vm229_vm2 = vcmp.eq.s32.totalorder %v226_v14, %v228_v16  ;;  %vm232_vm5 = vcmp.ge.s32.totalorder %v223_v12, %v225_v13 }
  0x24   :  { %421 = vmatprep.subr.mxu0 %v45_v4  ;;  %vm233_vm6 = vmand %vm229_vm2, %vm231_vm3  ;;  %p504_p13 = por %p503_p12, %p502_p11 }
  0x25   :  { %422 = vmatpush3.msra.mxu0 %v45_v4  ;;  %vm230_vm4 = vcmp.eq.s32.totalorder %v227_v15, %v228_v16 }
  0x26   :  { %424 = vmatmul.mubr.msk.f32.vlgmr.msra.gmra.mxu0 %vm49_vm0, %v44_v5  ;;  %vm234_vm7 = vmand %vm230_vm4, %vm232_vm5  ;;  %p505_p0 = pnand %p504_p13, %p498_p10 }
  0xe6   :  { %v425_v6 = vpop.f32.mrf.mxu0 }
  0xe7   :  { %426 = vmatprep.subr.msk.mxu1 %vm137_vm1, %v425_v6 }
  0xe8   :  { %v122_v7 = vpop.f32.mrf.mxu0  ;;  %427 = vmatpush3.xpose.msk.msra.mxu1 %vm137_vm1, %v425_v6 }
  0xe9   :  { %133 = vrot.lane.b32.xlu0 %v122_v7, %s549_s0  ;;  %428 = vmatprep.subr.msk.mxu1 %vm137_vm1, %v122_v7 }
  0xec   :  { %429 = vmatpush3.xpose.msk.msra.mxu1 %vm137_vm1, %v122_v7 }
  0xed   :  { %135 = vrot.lane.b32.xlu0 %v425_v6, %s549_s0 }
 0x15b   :  { %v134_v8 = vpop.permute.xlu0 %133 }
 0x15c   :  { %430 = vmatprep.mubr.msk.f32.mxu1 %vm137_vm1, %v134_v8 }
 0x15f   :  { %v136_v9 = vpop.permute.xlu0 %135 }
 0x160   :  { %431 = vmatmul.mubr.msk.f32.vlgmr.msra.gmra.mxu1 %vm137_vm1, %v136_v9 }
 0x220   :  { %v432_v17 = vpop.f32.mrf.mxu1 }
 0x221   :  { %v236_v21 = vsel %vm234_vm7, %v432_v17, -inf }
 0x222   :  { %v212_v18 = vpop.f32.mrf.mxu1  ;;  %v240_v22 = vsel %vm137_vm1, %v236_v21, -inf }
 0x223   :  { %v235_v19 = vsel %vm233_vm6, %v212_v18, -inf }
 0x224   :  { %v237_v20 = vsel %vm137_vm1, %v235_v19, -inf }
 0x225   :  { %238 = vmax.xlane.f32.xlu1 %v237_v20 }
 0x229   :  { %241 = vmax.xlane.f32.xlu1 %v240_v22 }
 0x2ae   :  { %v239_v23 = vpop.xlane.xlu1 %238 }
 0x2af   :  { %v243_v24 = vsub.f32 %v235_v19, %v239_v23 }
 0x2b1   :  { %v245_v25 = vmul.f32 1.442695, %v243_v24 }
 0x2b2   :  { %v242_v26 = vpop.xlane.xlu1 %241 }
 0x2b3   :  { %449 = vpow2.f32 %v245_v25  ;;  %v244_v27 = vsub.f32 %v236_v21, %v242_v26 }
 0x2b5   :  { %v247_v28 = vmul.f32 1.442695, %v244_v27 }
 0x2b7   :  { %451 = vpow2.f32 %v247_v28 }
 0x2c0   :  { %v450_v29 = vpop.eup %449 }
 0x2c1   :  { %v249_v30 = vsel %vm137_vm1, %v450_v29, 0.0 }
 0x2c2   :  { %250 = vadd.xlane.f32.xlu0 %v249_v30 }
 0x2c4   :  { %v452_v31 = vpop.eup %451 }
 0x2c5   :  { %v252_v32 = vsel %vm137_vm1, %v452_v31, 0.0 }
 0x2c6   :  { %253 = vadd.xlane.f32.xlu1 %v252_v32 }
 0x2d7   :  { %261 = vrot.lane.b32.xlu1 %v425_v6, %s550_s1 }
 0x2db   :  { %259 = vrot.lane.b32.xlu1 %v122_v7, %s550_s1 }
 0x34b   :  { %v251_v33 = vpop.xlane.xlu0 %250 }
 0x34c   :  { %453 = vrcp.f32 %v251_v33 }
 0x34f   :  { %v254_v34 = vpop.xlane.xlu1 %253 }
 0x350   :  { %455 = vrcp.f32 %v254_v34 }
 0x353   :  { %v262_v35 = vpop.permute.xlu1 %261 }
 0x354   :  { %433 = vmatprep.subr.mxu0 %v262_v35 }
 0x355   :  { %434 = vmatpush3.msra.mxu0 %v262_v35 }
 0x357   :  { %v260_v36 = vpop.permute.xlu1 %259 }
 0x358   :  { %435 = vmatprep.subr.mxu0 %v260_v36 }
 0x359   :  { %v454_v37 = vpop.eup %453  ;;  %436 = vmatpush3.msra.mxu0 %v260_v36 }
 0x35a   :  { %v256_v38 = vmul.f32 %v454_v37, %v450_v29 }
 0x35c   :  { %437 = vmatprep.mubr.msk.f32.mxu0 %vm137_vm1, %v256_v38  ;;  %348 = vrot.lane.b32.xlu1 %v256_v38, %s551_s24 }
 0x35d   :  { %v456_v39 = vpop.eup %455 }
 0x35e   :  { %v258_v40 = vmul.f32 %v456_v39, %v452_v31 }
 0x360   :  { %350 = vrot.lane.b32.xlu1 %v258_v40, %s551_s24  ;;  %438 = vmatmul.mubr.msk.f32.vlgmr.msra.gmra.mxu0 %vm137_vm1, %v258_v40 }
 0x3ce   :  { %v349_v41 = vpop.permute.xlu1 %348 }
 0x3cf   :  { %v354_v42 = vadd.f32 %v349_v41, %v256_v38 }
 0x3d1   :  { %357 = vst.msk [vmem:[#allocation7] sm:$0xff] %vm356_vm8, %v354_v42 }
 0x3d2   :  { %v351_v43 = vpop.permute.xlu1 %350 }
 0x3d3   :  { %v355_v44 = vadd.f32 %v351_v43, %v258_v40 }
 0x3d5   :  { %358 = vst.msk [vmem:[#allocation7 + $0x8] sm:$0xff] %vm356_vm8, %v355_v44 }
 0x3d6   :  { %508 = shalt.err (!%p505_p0)
}
 0x3d7   :  { %370 = dma.vmem_to_hbm [thread:$0]  %s365_s26, 256, %s616_s2, [#allocation4], %s546_s15, %s546_s15, %s547_s16  }
 0x3d8   :  { %s553_s30 = smov [#allocation8]  }
 0x3d9   :  { %s376_s4 = sshll.u32 %s553_s30, 4  ;;  %s377_s4 = int_to_ptr.vmem [resolvable:$true] %s376_s4 }
 0x3da   :  { %s517_s5 = scalar_lea.vmem %s377_s4, 256  ;;  %p522_p2 = scmp.lt.s32.totalorder %s377_s4, %s377_s4 }
 0x3db   :  { %p518_p1 = scmp.ne.s32.totalorder %s377_s4, %s517_s5  ;;  %p523_p3 = scmp.lt.s32.totalorder %s517_s5, %s517_s5 }
 0x3dd   :  { %p524_p4 = por %p523_p3, %p522_p2 }
 0x3df   :  { %p525_p5 = pnand %p524_p4, %p518_p1 }
 0x420   :  { %v439_v45 = vpop.f32.mrf.mxu0 }
 0x421   :  { %347 = vst.msk [vmem:[#allocation8 + $0x8] sm:$0xff] %vm137_vm1, %v439_v45 }
 0x422   :  { %v337_v46 = vpop.f32.mrf.mxu0 }
 0x423   :  { %346 = vst.msk [vmem:[#allocation8] sm:$0xff] %vm137_vm1, %v337_v46 }
 0x424   :  { %528 = shalt.err (!%p525_p5)
}
 0x425   :  { %382 = dma.vmem_to_hbm [thread:$0]  %s377_s4, 256, %s617_s3, [#allocation9], %s546_s15, %s546_s15, %s547_s16  }
 0x426   :  { %541 = dma.done.wait [#allocation4], 256  }
 0x427   :  { %542 = vsyncadd [#allocation4], 4294967040 }
 0x428   :  { %543 = dma.done.wait [#allocation9], 256  }
 0x429   :  { %544 = vsyncadd [#allocation9], 4294967040 }
 0x42a   :  { %389 = vsyncpa [#allocation3], 1 }
 0x42b   :  { %390 = vsyncpa [#allocation6], 1 }
 0x42c   :  { %391 = vsyncpa [#allocation4], 1 }
 0x42d   :  { %392 = vsyncpa [#allocation9], 1 }

</bundles_post_ra>
